<compile_context>
chip_gen: v7x
topology: tpu7x:2x2x1
jax: 0.10.0
libtpu: 0.0.40
codegen_flags: <defaults>
</compile_context>

<pallas_src>
from types import SimpleNamespace

import jax
import jax.numpy as jnp
from jax.experimental import pallas as pl
from jax.experimental.pallas import tpu as pltpu


def _make_myloss_kernel(lambda1, lambda2):
    lam1 = float(lambda1)
    lam2 = float(lambda2)

    def myloss_kernel(target_ref, pred_ref, dis_lap_ref, alpha1_ref,
                      sno_lap_ref, alpha2_ref, out_ref):
        # ---- Frobenius term: cast each operand to f32 BEFORE subtracting.
        d = target_ref[...].astype(jnp.float32) - pred_ref[...].astype(jnp.float32)
        loss_ls = jnp.sum(d * d)

        # ---- dis regularizer: trace(a1^T L1 a1) == sum(a1 * (L1 @ a1)).
        a1 = alpha1_ref[...].astype(jnp.float32)
        la1 = jnp.dot(dis_lap_ref[...].astype(jnp.float32), a1,
                      preferred_element_type=jnp.float32)
        dis_reg = jnp.sum(a1 * la1)

        # ---- sno regularizer: trace(a2^T L2 a2) == sum(a2 * (L2 @ a2)).
        a2 = alpha2_ref[...].astype(jnp.float32)
        la2 = jnp.dot(sno_lap_ref[...].astype(jnp.float32), a2,
                      preferred_element_type=jnp.float32)
        sno_reg = jnp.sum(a2 * la2)

        out_ref[0, 0] = loss_ls + lam1 * dis_reg + lam2 * sno_reg

    return myloss_kernel


def myloss(target, prediction, dis_lap, sno_lap, alpha1, alpha2, sizes):
    """Pallas equivalent of Myloss.forward. Returns a scalar (float32)."""
    m, n = target.shape
    n1, k1 = alpha1.shape
    n2, k2 = alpha2.shape

    kernel = _make_myloss_kernel(sizes.lambda1, sizes.lambda2)

    vmem = pl.BlockSpec(memory_space=pltpu.MemorySpace.VMEM)
    smem = pl.BlockSpec(memory_space=pltpu.MemorySpace.SMEM)

    in_bytes = sum(a.size * a.dtype.itemsize
                   for a in (target, prediction, dis_lap, alpha1, sno_lap, alpha2))
    cost = pl.CostEstimate(
        flops=2 * n1 * n1 * k1 + 2 * n2 * n2 * k2 + 4 * m * n,
        transcendentals=0,
        bytes_accessed=in_bytes + 4,
    )

    out = pl.pallas_call(
        kernel,
        out_shape=jax.ShapeDtypeStruct((1, 1), jnp.float32),
        in_specs=[vmem, vmem, vmem, vmem, vmem, vmem],
        out_specs=smem,
        cost_estimate=cost,
    )(target, prediction, dis_lap, alpha1, sno_lap, alpha2)
    # Scalar result; the reference's trailing `.sum()` is a no-op on a scalar.
    # (When used inside a larger jitted step, this slice fuses for free.)
    return out[0, 0]


def _reference(target, prediction, dis_lap, sno_lap, alpha1, alpha2, sizes):
    loss_ls = jnp.sum((target - prediction) ** 2)
    dis_reg = jnp.trace(alpha1.T @ dis_lap @ alpha1)
    sno_reg = jnp.trace(alpha2.T @ sno_lap @ alpha2)
    return loss_ls + sizes.lambda1 * dis_reg + sizes.lambda2 * sno_reg


if __name__ == "__main__":
    key = jax.random.PRNGKey(0)
    k1, k2, k3, k4, k5, k6 = jax.random.split(key, 6)

    # Small shapes consistent with the module's forward:
    #   target / prediction : (16, 128)
    #   dis_lap (N1, N1)    : (32, 32),  alpha1 (N1, K1): (32, 16)
    #   sno_lap (N2, N2)    : (16, 16),  alpha2 (N2, K2): (16, 8)
    target     = jax.random.normal(k1, (16, 128), dtype=jnp.float32)
    prediction = jax.random.normal(k2, (16, 128), dtype=jnp.float32)

    d1 = jax.random.normal(k3, (32, 32), dtype=jnp.float32)
    dis_lap = 0.5 * (d1 + d1.T)                      # symmetric, Laplacian-like
    alpha1  = jax.random.normal(k4, (32, 16), dtype=jnp.float32)

    d2 = jax.random.normal(k5, (16, 16), dtype=jnp.float32)
    sno_lap = 0.5 * (d2 + d2.T)
    alpha2  = jax.random.normal(k6, (16, 8), dtype=jnp.float32)

    sizes = SimpleNamespace(lambda1=0.5, lambda2=0.25)

    loss = myloss(target, prediction, dis_lap, sno_lap, alpha1, alpha2, sizes)
    loss = jax.block_until_ready(loss)

    ref = _reference(target, prediction, dis_lap, sno_lap, alpha1, alpha2, sizes)
    assert jnp.allclose(loss, ref, rtol=1e-4, atol=1e-4), (loss, ref)

    print("KERNEL_OK")
</pallas_src>

<mosaic_0001>
module attributes {stable_mosaic.version = 11 : i64} {
  func.func @myloss_kernel(%arg0: memref<16x128xf32, #tpu.memory_space<vmem>>, %arg1: memref<16x128xf32, #tpu.memory_space<vmem>>, %arg2: memref<32x32xf32, #tpu.memory_space<vmem>>, %arg3: memref<32x16xf32, #tpu.memory_space<vmem>>, %arg4: memref<16x16xf32, #tpu.memory_space<vmem>>, %arg5: memref<16x8xf32, #tpu.memory_space<vmem>>, %arg6: memref<1x1xf32, #tpu.memory_space<smem>>) attributes {dimension_semantics = [], scalar_prefetch = 0 : i64, scratch_operands = 0 : i64, tpu.core_type = #tpu.core_type<tc>} {
    %c0 = arith.constant 0 : index
    %c0_0 = arith.constant 0 : index
    %0 = vector.load %arg0[%c0, %c0_0] : memref<16x128xf32, #tpu.memory_space<vmem>>, vector<16x128xf32>
    %c0_1 = arith.constant 0 : index
    %c0_2 = arith.constant 0 : index
    %1 = vector.load %arg1[%c0_1, %c0_2] : memref<16x128xf32, #tpu.memory_space<vmem>>, vector<16x128xf32>
    %2 = arith.subf %0, %1 : vector<16x128xf32>
    %3 = arith.mulf %2, %2 : vector<16x128xf32>
    %4 = vector.shape_cast %3 : vector<16x128xf32> to vector<1x16x128xf32>
    %cst = arith.constant dense<0.000000e+00> : vector<1xf32>
    %5 = vector.multi_reduction <add>, %4, %cst [1, 2] : vector<1x16x128xf32> to vector<1xf32>
    %6 = vector.shape_cast %5 : vector<1xf32> to vector<1x1x1xf32>
    %7 = vector.extract %6[0, 0, 0] : f32 from vector<1x1x1xf32>
    %c0_3 = arith.constant 0 : index
    %c0_4 = arith.constant 0 : index
    %8 = vector.load %arg3[%c0_3, %c0_4] : memref<32x16xf32, #tpu.memory_space<vmem>>, vector<32x16xf32>
    %c0_5 = arith.constant 0 : index
    %c0_6 = arith.constant 0 : index
    %9 = vector.load %arg2[%c0_5, %c0_6] : memref<32x32xf32, #tpu.memory_space<vmem>>, vector<32x32xf32>
    %cst_7 = arith.constant dense<0.000000e+00> : vector<32x16xf32>
    %10 = tpu.matmul %9, %8, %cst_7 {dimension_numbers = #tpu.dot_dimension_numbers<[1], [0], [0], [1], [0, 0, 1, 1], [], []>} : vector<32x32xf32>, vector<32x16xf32>, vector<32x16xf32> -> vector<32x16xf32>
    %11 = arith.mulf %8, %10 : vector<32x16xf32>
    %12 = vector.shape_cast %11 : vector<32x16xf32> to vector<1x32x16xf32>
    %cst_8 = arith.constant dense<0.000000e+00> : vector<1xf32>
    %13 = vector.multi_reduction <add>, %12, %cst_8 [1, 2] : vector<1x32x16xf32> to vector<1xf32>
    %14 = vector.shape_cast %13 : vector<1xf32> to vector<1x1x1xf32>
    %15 = vector.extract %14[0, 0, 0] : f32 from vector<1x1x1xf32>
    %c0_9 = arith.constant 0 : index
    %c0_10 = arith.constant 0 : index
    %16 = vector.load %arg5[%c0_9, %c0_10] : memref<16x8xf32, #tpu.memory_space<vmem>>, vector<16x8xf32>
    %c0_11 = arith.constant 0 : index
    %c0_12 = arith.constant 0 : index
    %17 = vector.load %arg4[%c0_11, %c0_12] : memref<16x16xf32, #tpu.memory_space<vmem>>, vector<16x16xf32>
    %cst_13 = arith.constant dense<0.000000e+00> : vector<16x8xf32>
    %18 = tpu.matmul %17, %16, %cst_13 {dimension_numbers = #tpu.dot_dimension_numbers<[1], [0], [0], [1], [0, 0, 1, 1], [], []>} : vector<16x16xf32>, vector<16x8xf32>, vector<16x8xf32> -> vector<16x8xf32>
    %19 = arith.mulf %16, %18 : vector<16x8xf32>
    %20 = vector.shape_cast %19 : vector<16x8xf32> to vector<1x16x8xf32>
    %cst_14 = arith.constant dense<0.000000e+00> : vector<1xf32>
    %21 = vector.multi_reduction <add>, %20, %cst_14 [1, 2] : vector<1x16x8xf32> to vector<1xf32>
    %22 = vector.shape_cast %21 : vector<1xf32> to vector<1x1x1xf32>
    %23 = vector.extract %22[0, 0, 0] : f32 from vector<1x1x1xf32>
    %cst_15 = arith.constant 5.000000e-01 : f32
    %24 = arith.mulf %cst_15, %15 : f32
    %25 = arith.addf %7, %24 : f32
    %cst_16 = arith.constant 2.500000e-01 : f32
    %26 = arith.mulf %cst_16, %23 : f32
    %27 = arith.addf %25, %26 : f32
    %c0_17 = arith.constant 0 : index
    %c0_18 = arith.constant 0 : index
    %28 = memref.load %arg6[%c0_17, %c0_18] : memref<1x1xf32, #tpu.memory_space<smem>>
    memref.store %27, %arg6[%c0_17, %c0_18] : memref<1x1xf32, #tpu.memory_space<smem>>
    return
  }
}

</mosaic_0001>

<bundles_post_ra>
// kernel: tpu_custom_call.1
= control target key start
LH: loop header
LB: loop body
LE: loop exit
PB: predicated region body
PF: predicated region fallthrough
CT: control target
= control target key end

     0   :  { %11 = vsyncpa [#allocation3], 0  ;;  %s515_s0 = inlined_call_operand.vmem [shape: f32[16,128], index: 0, kind: input, shape index: {}]   ;;  %s516_s1 = inlined_call_operand.hbm [shape: f32[16,128], index: 1, kind: input, shape index: {}]   ;;  %s517_s2 = inlined_call_operand.vmem [shape: f32[32,32], index: 2, kind: input, shape index: {}]   ;;  %s518_s3 = inlined_call_operand.vmem [shape: f32[32,16], index: 3, kind: input, shape index: {}]   ;;  %s519_s4 = inlined_call_operand.vmem [shape: f32[16,16], index: 4, kind: input, shape index: {}]   ;;  %s520_s5 = inlined_call_operand.vmem [shape: f32[16,8], index: 5, kind: input, shape index: {}]   ;;  %s521_s6 = inlined_call_operand.hbm [shape: f32[1,1], index: 6, kind: output, shape index: {}]  }
   0x1   :  { %12 = vsyncpa [#allocation4], 0  ;;  %s400_s21 = smov [#allocation2]   ;;  %s364_s25 = scalar_lea.hbm %s516_s1, 256 }
   0x2   :  { %s20_s22 = sshll.u32 %s400_s21, 4  ;;  %p365_p0 = scmp.ne.s32.totalorder %s516_s1, %s364_s25  ;;  %s21_s22 = int_to_ptr.vmem [resolvable:$true] %s20_s22 }
   0x3   :  { %p368_p1 = scmp.lt.u32.totalorder %s364_s25, %s516_s1 }
   0x5   :  { %p370_p2 = pnand %p368_p1, %p365_p0 }
   0x7   :  { %373 = shalt.err (!%p370_p2)
}
   0x8   :  { %s374_s30 = scalar_lea.vmem %s21_s22, 256  ;;  %p379_p4 = scmp.lt.s32.totalorder %s21_s22, %s21_s22 }
   0x9   :  { %p375_p3 = scmp.ne.s32.totalorder %s21_s22, %s374_s30  ;;  %p380_p5 = scmp.lt.s32.totalorder %s374_s30, %s374_s30 }
   0xb   :  { %p381_p6 = por %p380_p5, %p379_p4 }
   0xd   :  { %p382_p7 = pnand %p381_p6, %p375_p3 }
   0xf   :  { %385 = shalt.err (!%p382_p7)
}
  0x10   :  { %s401_s7 = smov 128   ;;  %s402_s8 = smov 8  }
  0x11   :  { %26 = dma.hbm_to_vmem [thread:$0]  %s516_s1, 256, %s21_s22, [#allocation3], %s401_s7, %s401_s7, %s402_s8  }
  0x12   :  { %396 = dma.done.wait [#allocation3], 256  }
  0x13   :  { %397 = vsyncadd [#allocation3], 4294967040  ;;  %v56_v0 = vld [vmem:[%s518_s3] sm:$0xff]  ;;  %v57_v1 = vld [vmem:[%s518_s3 + $0x8] sm:$0xff]  ;;  %vm64_vm0 = vcmask 261120   ;;  %vm166_vm1 = vcmask 130048  }
  0x14   :  { %v58_v2 = vld [vmem:[%s518_s3 + $0x10] sm:$0xff]  ;;  %v342_v3 = vpack.c.bf16 %v57_v1, %v56_v0  ;;  %v59_v4 = vld [vmem:[%s518_s3 + $0x18] sm:$0xff]  ;;  %v183_v5 = vld [vmem:[%s520_s5] sm:$0xff]  ;;  %vm270_vm2 = vcmask 64512   ;;  %s386_s18 = scalar_lea.hbm %s521_s6, 16 }
  0x15   :  { %v184_v6 = vld [vmem:[%s520_s5 + $0x8] sm:$0xff]  ;;  %v346_v7 = vpack.c.bf16 %v59_v4, %v58_v2  ;;  %v60_v9 = vld [vmem:[%s517_s2] sm:$0xff]  ;;  %v62_v13 = vld [vmem:[%s517_s2 + $0x10] sm:$0xff]  ;;  %p387_p8 = scmp.ne.s32.totalorder %s521_s6, %s386_s18  ;;  %p390_p9 = scmp.lt.u32.totalorder %s386_s18, %s521_s6 }
  0x16   :  { %v350_v8 = vpack.c.bf16 %v184_v6, %v183_v5  ;;  %343 = vmatprep.subr.bf16.mxu0 %v342_v3  ;;  %329 = vmatprep.mubr.msk.f32.mxu0 %vm64_vm0, %v60_v9  ;;  %v185_v10 = vld [vmem:[%s519_s4] sm:$0xff]  ;;  %v186_v11 = vld [vmem:[%s519_s4 + $0x8] sm:$0xff]  ;;  %v63_v14 = vld [vmem:[%s517_s2 + $0x18] sm:$0xff] }
  0x17   :  { %345 = vmatpush3.bf16.msra.mxu0 %v342_v3  ;;  %339 = vmatprep.mubr.msk.f32.mxu1 %vm166_vm1, %v185_v10  ;;  %v61_v12 = vld [vmem:[%s517_s2 + $0x8] sm:$0xff]  ;;  %v38_v15 = vld [vmem:[%s515_s0] sm:$0xff]  ;;  %p392_p10 = pnand %p390_p9, %p387_p8 }
  0x18   :  { %351 = vmatprep.subr.bf16.mxu1 %v350_v8  ;;  %347 = vmatprep.subr.bf16.mxu0 %v346_v7  ;;  %v39_v16 = vld [vmem:[%s515_s0 + $0x8] sm:$0xff]  ;;  %v40_v17 = vld [vmem:[#allocation2] sm:$0xff] }
  0x19   :  { %353 = vmatpush3.bf16.msra.mxu1 %v350_v8  ;;  %v41_v18 = vld [vmem:[#allocation2 + $0x8] sm:$0xff]  ;;  %v42_v19 = vsub.f32 %v38_v15, %v40_v17 }
  0x1a   :  { %v43_v20 = vsub.f32 %v39_v16, %v41_v18 }
  0x1b   :  { %349 = vmatpush3.bf16.msra.mxu0 %v346_v7  ;;  %v44_v21 = vmul.f32 %v42_v19, %v42_v19 }
  0x1c   :  { %340 = vmatmul.mubr.msk.f32.vlgmr.msra.gmra.mrb[0].mxu1 %vm166_vm1, %v186_v11  ;;  %v45_v22 = vmul.f32 %v43_v20, %v43_v20 }
  0x1e   :  { %330 = vmatmul.mubr.msk.f32.vlgmr.msra.gmra.mrb[0].mxu0 %vm64_vm0, %v61_v12  ;;  %v46_v23 = vadd.f32 %v45_v22, %v44_v21 }
  0x1f   :  { %332 = vmatprep.mubr.msk.f32.mxu0 %vm64_vm0, %v62_v13 }
  0x20   :  { %47 = vadd.xlane.f32.xlu0 %v46_v23 }
  0x22   :  { %333 = vmatmul.mubr.msk.f32.gmra.mrb[2].mxu0 %vm64_vm0, %v63_v14 }
  0xad   :  { %v48_v46 = vpop.xlane.xlu0 %47 }
  0xae   :  { %v49_v47 = vrot.slane %v48_v46, 4 }
  0xb0   :  { %v50_v48 = vadd.f32 %v49_v47, %v48_v46 }
  0xb2   :  { %v51_v49 = vrot.slane %v50_v48, 2 }
  0xb4   :  { %v52_v50 = vadd.f32 %v51_v49, %v50_v48 }
  0xb6   :  { %v53_v51 = vrot.slane %v52_v50, 1 }
  0xb8   :  { %v54_v52 = vadd.f32 %v53_v51, %v52_v50 }
  0xba   :  { %354 = vpush %v54_v52 }
  0xeb   :  { %s355_s0 = spop %354 }
  0xef   :  { %v341_v24 = vpop.f32.mrb[0].mxu1 }
  0xf0   :  { %v269_v25 = vmul.f32 %v341_v24, %v184_v6  ;;  %v259_v26 = vpop.f32.mrb[1].mxu1 }
  0xf1   :  { %v268_v27 = vmul.f32 %v259_v26, %v183_v5  ;;  %v331_v28 = vpop.f32.mrb[0].mxu0 }
  0xf2   :  { %v272_v29 = vsel %vm270_vm2, %v269_v25, 0.0  ;;  %v163_v30 = vmul.f32 %v331_v28, %v57_v1  ;;  %v143_v31 = vpop.f32.mrb[1].mxu0 }
  0xf3   :  { %v271_v32 = vsel %vm270_vm2, %v268_v27, 0.0  ;;  %v162_v33 = vmul.f32 %v143_v31, %v56_v0 }
  0xf4   :  { %v273_v34 = vadd.f32 %v272_v29, %v271_v32  ;;  %v168_v35 = vsel %vm166_vm1, %v163_v30, 0.0 }
  0xf5   :  { %v167_v36 = vsel %vm166_vm1, %v162_v33, 0.0  ;;  %v334_v37 = vpop.f32.mrb[2].mxu0 }
  0xf6   :  { %274 = vadd.xlane.f32.xlu1 %v273_v34  ;;  %v169_v38 = vadd.f32 %v168_v35, %v167_v36  ;;  %v153_v39 = vpop.f32.mrb[3].mxu0  ;;  %v165_v40 = vmul.f32 %v334_v37, %v59_v4 }
  0xf7   :  { %v164_v41 = vmul.f32 %v153_v39, %v58_v2 }
  0xf8   :  { %v172_v44 = vsel %vm166_vm1, %v165_v40, 0.0 }
  0xf9   :  { %v170_v42 = vsel %vm166_vm1, %v164_v41, 0.0 }
  0xfa   :  { %v171_v43 = vadd.f32 %v170_v42, %v169_v38 }
  0xfc   :  { %v173_v45 = vadd.f32 %v172_v44, %v171_v43 }
  0xfe   :  { %174 = vadd.xlane.f32.xlu0 %v173_v45 }
 0x183   :  { %v275_v53 = vpop.xlane.xlu1 %274 }
 0x184   :  { %v276_v54 = vrot.slane %v275_v53, 4 }
 0x186   :  { %v277_v55 = vadd.f32 %v276_v54, %v275_v53 }
 0x188   :  { %v278_v56 = vrot.slane %v277_v55, 2 }
 0x18a   :  { %v279_v60 = vadd.f32 %v278_v56, %v277_v55 }
 0x18b   :  { %v175_v57 = vpop.xlane.xlu0 %174 }
 0x18c   :  { %v176_v58 = vrot.slane %v175_v57, 4  ;;  %v280_v63 = vrot.slane %v279_v60, 1 }
 0x18e   :  { %v177_v59 = vadd.f32 %v176_v58, %v175_v57  ;;  %v281_v2 = vadd.f32 %v280_v63, %v279_v60 }
 0x190   :  { %v178_v61 = vrot.slane %v177_v59, 2 }
 0x192   :  { %v179_v62 = vadd.f32 %v178_v61, %v177_v59 }
 0x194   :  { %v180_v0 = vrot.slane %v179_v62, 1 }
 0x196   :  { %v181_v1 = vadd.f32 %v180_v0, %v179_v62 }
 0x198   :  { %356 = vpush %v181_v1 }
 0x199   :  { %358 = vpush %v281_v2 }
 0x1c9   :  { %s357_s2 = spop %356 }
 0x1ca   :  { %s283_s11 = smul.f32 0.5, %s357_s2  ;;  %s359_s12 = spop %358 }
 0x1cb   :  { %s285_s14 = smul.f32 0.25, %s359_s12 }
 0x1cc   :  { %s284_s13 = sadd.f32 %s355_s0, %s283_s11 }
 0x1ce   :  { %s286_s15 = sadd.f32 %s285_s14, %s284_s13 }
 0x1d0   :  { %288 = sst [smem:[#allocation5]] %s286_s15 }
 0x1d1   :  { %395 = shalt.err (!%p392_p10)
}
 0x1d2   :  { %s403_s22 = smov [#allocation5]  }
 0x1d3   :  { %296 = dma.smem_to_hbm %s403_s22, 16, %s521_s6, [#allocation4]  }
 0x1d4   :  { %398 = dma.done.wait [#allocation4], 16  }
 0x1d5   :  { %399 = vsyncadd [#allocation4], 4294967280 }
 0x1d6   :  { %300 = sfence }
 0x1d7   :  { %301 = vsyncpa [#allocation3], 1 }
 0x1d8   :  { %302 = vsyncpa [#allocation4], 1 }

</bundles_post_ra>
